<compile_context>
chip_gen: v7x
topology: tpu7x:2x2x1
jax: 0.10.0
libtpu: 0.0.40
codegen_flags: <defaults>
</compile_context>

<pallas_src>
import functools

import jax
import jax.numpy as jnp
from jax.experimental import pallas as pl
from jax.experimental.pallas import tpu as pltpu


_LANE = 128

# How many exact bf16 chunks are needed to represent the dtype's significand.
_CHUNKS_FOR_DTYPE = {
    jnp.dtype(jnp.float32): 3,    # 24-bit significand -> 3 x 8-bit chunks
    jnp.dtype(jnp.float16): 2,    # 11-bit significand -> 2 chunks
    jnp.dtype(jnp.bfloat16): 1,
}


def _round_up(x, m):
    return ((x + m - 1) // m) * m


def _vmem_capacity_bytes():
    try:
        info = pltpu.get_tpu_info()
        cap = getattr(info, "vmem_capacity_bytes", None)
        if cap:
            return int(cap)
    except Exception:
        pass
    return 64 << 20  # conservative default (v7x physical VMEM)


def _upsample_rows_kernel(x_ref, r_ref, o_ref, *, n_chunks):
    """out_rows = x_rows @ R, computed bit-exactly via bf16 chunking.

    x_ref: (TR, W)       input rows (W on lanes).
    r_ref: (W, s*s*W)    static 0/1 nearest-neighbour replication matrix (bf16).
    o_ref: (TR, s*s*W)   the s output rows of each input row, contiguous
                         (row-major identical to the final NCHW layout).
    """
    r = r_ref[...]
    rem = x_ref[...].astype(jnp.float32)
    acc = jnp.zeros(o_ref.shape, jnp.float32)
    for _ in range(n_chunks):
        chunk = rem.astype(jnp.bfloat16)                 # exact top bf16 chunk
        acc = acc + jnp.dot(chunk, r, preferred_element_type=jnp.float32)
        rem = rem - chunk.astype(jnp.float32)            # exact remainder
    o_ref[...] = acc.astype(o_ref.dtype)


def _pick_rows_per_block(total_rows, out_row_bytes, per_row_bytes, *,
                         row_align, target_out_bytes, vmem_budget):
    """Rows per grid step: sublane-aligned, VMEM-budgeted, and (for large
    tensors) leaving enough -- preferably an even number of -- grid steps so
    both v7x TensorCores get pipelined work.  Need NOT divide total_rows."""
    cap = max(row_align,
              (vmem_budget // per_row_bytes) // row_align * row_align)
    tr = max(row_align,
             (target_out_bytes // out_row_bytes) // row_align * row_align)
    tr = min(tr, cap)

    total_out = total_rows * out_row_bytes
    if total_out >= (64 << 20):
        min_blocks = 8            # >= 4 pipelined steps per v7x TensorCore
    elif total_out >= (4 << 20):
        min_blocks = 2
    else:
        min_blocks = 1            # tiny tensor: one step beats per-step tax
    if min_blocks > 1:
        tr = min(tr, max(row_align,
                         (total_rows // min_blocks) // row_align * row_align))
    if tr >= total_rows:
        return total_rows

    blocks = pl.cdiv(total_rows, tr)
    if blocks % 2:                # prefer an even step count (2 TensorCores)
        t = tr
        while t > row_align:
            t -= row_align
            if pl.cdiv(total_rows, t) % 2 == 0:
                return t
    return tr


def upsample_nearest(x, scale_factor=2, *, target_block_bytes=None):
    """NCHW equivalent of F.interpolate(x, scale_factor=s, mode='nearest')."""
    sf = float(scale_factor)
    if not sf.is_integer() or sf < 1:
        raise ValueError("only positive integer scale_factor is supported")
    s = int(sf)
    if s == 1:
        return x
    if not jnp.issubdtype(x.dtype, jnp.floating):
        raise NotImplementedError("only floating dtypes are supported")

    N, C, H, W = x.shape
    dtype = jnp.dtype(x.dtype)
    itemsize = dtype.itemsize
    n_chunks = _CHUNKS_FOR_DTYPE.get(dtype, 3)

    rows = N * C * H
    out_cols = s * s * W
    x_rows = x.reshape(rows, W)                       # free reshape (W is minor)

    # Static 0/1 replication matrix: R[w, dt*s*W + w*s + i] = 1 for dt,i < s.
    col = jnp.arange(out_cols, dtype=jnp.int32)
    src = (col % (s * W)) // s
    rep = (jnp.arange(W, dtype=jnp.int32)[:, None] == src[None, :]
           ).astype(jnp.bfloat16)                     # (W, s*s*W)

    # ---- generation-aware tiling & padded VMEM accounting ------------------
    big_vmem = _vmem_capacity_bytes() >= (100 << 20)  # v5e / v6e (128 MiB)
    target = target_block_bytes if target_block_bytes is not None else (
        (16 << 20) if big_vmem else (8 << 20))
    ceiling = (88 << 20) if big_vmem else (40 << 20)

    sub = 8 * max(1, 4 // itemsize)                   # sublane multiple (dtype)
    in_row_bytes = _round_up(W, _LANE) * itemsize
    out_row_bytes = _round_up(out_cols, _LANE) * itemsize
    acc_row_bytes = _round_up(out_cols, _LANE) * 4    # f32 accumulator
    rem_row_bytes = _round_up(W, _LANE) * 4           # f32 remainder
    chk_row_bytes = _round_up(W, _LANE) * 2           # bf16 chunk
    per_row_bytes = (2 * (in_row_bytes + out_row_bytes)  # double-buffered I/O
                     + acc_row_bytes + rem_row_bytes + chk_row_bytes)
    rep_bytes = _round_up(W, 16) * _round_up(out_cols, _LANE) * 2

    budget = max(ceiling - 2 * rep_bytes - (6 << 20), 8 << 20)
    tr = _pick_rows_per_block(rows, out_row_bytes, per_row_bytes,
                              row_align=sub, target_out_bytes=target,
                              vmem_budget=budget)
    num_blocks = pl.cdiv(rows, tr)

    tr_pad = _round_up(tr, sub)
    vmem_need = tr_pad * per_row_bytes + 2 * rep_bytes + (2 << 20)
    vmem_limit = int(min(max(vmem_need, 16 << 20), ceiling))

    kernel = functools.partial(_upsample_rows_kernel, n_chunks=n_chunks)

    out_rows = pl.pallas_call(
        kernel,
        out_shape=jax.ShapeDtypeStruct((rows, out_cols), dtype),
        grid_spec=pltpu.PrefetchScalarGridSpec(
            num_scalar_prefetch=0,
            grid=(num_blocks,),
            in_specs=[
                pl.BlockSpec((tr, W), lambda b: (b, 0)),
                pl.BlockSpec((W, out_cols), lambda b: (0, 0)),  # fetched once
            ],
            out_specs=pl.BlockSpec((tr, out_cols), lambda b: (b, 0)),
        ),
        compiler_params=pltpu.CompilerParams(
            dimension_semantics=("parallel",),
            vmem_limit_bytes=vmem_limit,
        ),
        cost_estimate=pl.CostEstimate(
            flops=2 * n_chunks * rows * W * out_cols,
            transcendentals=0,
            bytes_accessed=(1 + s * s) * rows * W * itemsize + W * out_cols * 2,
        ),
    )(x_rows, rep)

    # (rows, s*s*W) row-major == (N, C, H*s, W*s): metadata-only reshape.
    return out_rows.reshape(N, C, H * s, W * s)


def upsample_reference(x_nchw, scale_factor=2):
    s = int(scale_factor)
    return jnp.repeat(jnp.repeat(x_nchw, s, axis=2), s, axis=3)


if __name__ == "__main__":
    k1, k2, k3, k4 = jax.random.split(jax.random.PRNGKey(0), 4)

    # 1) Main test: small NCHW activation, scale_factor=2 (the YOLOv3 config).
    x1 = jax.random.normal(k1, (2, 4, 16, 16), dtype=jnp.float32)
    y1 = jax.block_until_ready(upsample_nearest(x1, scale_factor=2))
    assert y1.shape == (2, 4, 32, 32) and y1.dtype == x1.dtype, y1.shape
    assert jnp.allclose(y1, upsample_reference(x1, 2)), "s=2 mismatch"

    # 2) scale_factor=3, odd-ish dims.
    x2 = jax.random.normal(k2, (1, 8, 12, 20), dtype=jnp.float32)
    y2 = jax.block_until_ready(upsample_nearest(x2, scale_factor=3))
    assert y2.shape == (1, 8, 36, 60), y2.shape
    assert jnp.allclose(y2, upsample_reference(x2, 3)), "s=3 mismatch"

    # 3) Force a multi-step grid with a non-dividing, masked tail block
    #    (rows = 150, block = 8 rows -> 19 steps, last one partial).
    x3 = jax.random.normal(k3, (1, 3, 50, 28), dtype=jnp.float32)
    y3 = jax.block_until_ready(
        upsample_nearest(x3, scale_factor=2, target_block_bytes=4096))
    assert y3.shape == (1, 3, 100, 56), y3.shape
    assert jnp.allclose(y3, upsample_reference(x3, 2)), "tiled/tail mismatch"

    # 4) bf16 path (single-chunk matmul).
    x4 = jax.random.normal(k4, (1, 4, 8, 8), dtype=jnp.float32).astype(jnp.bfloat16)
    y4 = jax.block_until_ready(upsample_nearest(x4, scale_factor=2))
    assert y4.shape == (1, 4, 16, 16) and y4.dtype == jnp.bfloat16, y4.shape
    assert jnp.allclose(y4.astype(jnp.float32),
                        upsample_reference(x4, 2).astype(jnp.float32),
                        rtol=1e-2, atol=1e-2), "bf16 mismatch"

    print("KERNEL_OK")
</pallas_src>

<mosaic_0001>
module attributes {stable_mosaic.version = 11 : i64} {
  func.func @_upsample_rows_kernel(%arg0: i32, %arg1: memref<128x16xf32, #tpu.memory_space<vmem>>, %arg2: memref<16x64xbf16, #tpu.memory_space<vmem>>, %arg3: memref<128x64xf32, #tpu.memory_space<vmem>>) attributes {dimension_semantics = [#tpu.dimension_semantics<parallel>], iteration_bounds = array<i64: 1>, scalar_prefetch = 0 : i64, scratch_operands = 0 : i64, tpu.core_type = #tpu.core_type<tc>, window_params = [{transform_indices = @transform_0, window_bounds = array<i64: 128, 16>}, {pipeline_mode = #tpu.pipeline_mode<synchronous>, transform_indices = @transform_1, window_bounds = array<i64: 16, 64>}, {transform_indices = @transform_2, window_bounds = array<i64: 128, 64>}]} {
    %c0 = arith.constant 0 : index
    %c0_0 = arith.constant 0 : index
    %0 = vector.load %arg2[%c0, %c0_0] : memref<16x64xbf16, #tpu.memory_space<vmem>>, vector<16x64xbf16>
    %c0_1 = arith.constant 0 : index
    %c0_2 = arith.constant 0 : index
    %1 = vector.load %arg1[%c0_1, %c0_2] : memref<128x16xf32, #tpu.memory_space<vmem>>, vector<128x16xf32>
    %cst = arith.constant 0.000000e+00 : f32
    %2 = vector.broadcast %cst : f32 to vector<128x64xf32>
    %3 = arith.truncf %1 : vector<128x16xf32> to vector<128x16xbf16>
    %cst_3 = arith.constant dense<0.000000e+00> : vector<128x64xf32>
    %4 = tpu.matmul %3, %0, %cst_3 {dimension_numbers = #tpu.dot_dimension_numbers<[1], [0], [0], [1], [0, 0, 1, 1], [], []>} : vector<128x16xbf16>, vector<16x64xbf16>, vector<128x64xf32> -> vector<128x64xf32>
    %5 = arith.addf %2, %4 : vector<128x64xf32>
    %6 = arith.extf %3 : vector<128x16xbf16> to vector<128x16xf32>
    %7 = arith.subf %1, %6 : vector<128x16xf32>
    %8 = arith.truncf %7 : vector<128x16xf32> to vector<128x16xbf16>
    %cst_4 = arith.constant dense<0.000000e+00> : vector<128x64xf32>
    %9 = tpu.matmul %8, %0, %cst_4 {dimension_numbers = #tpu.dot_dimension_numbers<[1], [0], [0], [1], [0, 0, 1, 1], [], []>} : vector<128x16xbf16>, vector<16x64xbf16>, vector<128x64xf32> -> vector<128x64xf32>
    %10 = arith.addf %5, %9 : vector<128x64xf32>
    %11 = arith.extf %8 : vector<128x16xbf16> to vector<128x16xf32>
    %12 = arith.subf %7, %11 : vector<128x16xf32>
    %13 = arith.truncf %12 : vector<128x16xf32> to vector<128x16xbf16>
    %cst_5 = arith.constant dense<0.000000e+00> : vector<128x64xf32>
    %14 = tpu.matmul %13, %0, %cst_5 {dimension_numbers = #tpu.dot_dimension_numbers<[1], [0], [0], [1], [0, 0, 1, 1], [], []>} : vector<128x16xbf16>, vector<16x64xbf16>, vector<128x64xf32> -> vector<128x64xf32>
    %15 = arith.addf %10, %14 : vector<128x64xf32>
    %c0_6 = arith.constant 0 : index
    %c0_7 = arith.constant 0 : index
    %16 = vector.load %arg3[%c0_6, %c0_7] : memref<128x64xf32, #tpu.memory_space<vmem>>, vector<128x64xf32>
    tpu.vector_store %arg3[%c0_6, %c0_7], %15 {strides = array<i32>} : memref<128x64xf32, #tpu.memory_space<vmem>>, vector<128x64xf32>,
    return
  }
  func.func @transform_0(%arg0: i32) -> (i32, i32) {
    %c0_i32 = arith.constant 0 : i32
    %c0_i32_0 = arith.constant 0 : i32
    return %arg0, %c0_i32 : i32, i32
  }
  func.func @transform_1(%arg0: i32) -> (i32, i32) {
    %c0_i32 = arith.constant 0 : i32
    %c0_i32_0 = arith.constant 0 : i32
    %c0_i32_1 = arith.constant 0 : i32
    return %c0_i32, %c0_i32_0 : i32, i32
  }
  func.func @transform_2(%arg0: i32) -> (i32, i32) {
    %c0_i32 = arith.constant 0 : i32
    %c0_i32_0 = arith.constant 0 : i32
    return %arg0, %c0_i32 : i32, i32
  }
}

</mosaic_0001>

<bundles_post_ra>
// kernel: tpu_custom_call.1
= control target key start
LH: loop header
LB: loop body
LE: loop exit
PB: predicated region body
PF: predicated region fallthrough
CT: control target
= control target key end

     0   :  { %vm84_vm0 = vcmask 130048   ;;  %vm504_vm1 = vcmask 523264   ;;  %s835_s1 = inlined_call_operand.vmem [shape: bf16[16,64], index: 1, kind: input, shape index: {}]   ;;  %s836_s0 = inlined_call_operand.vmem [shape: f32[128,16], index: 0, kind: input, shape index: {}]   ;;  %s837_s2 = inlined_call_operand.vmem [shape: f32[128,64], index: 2, kind: output, shape index: {}]  }
   0x1   :  { %v665_v0 = vld [vmem:[%s835_s1] sm:$0xff]   ;;  %v15_v2 = vld [vmem:[%s836_s0 + $0x8] sm:$0xff]  ;;  %v16_v3 = vld [vmem:[%s836_s0 + $0x10] sm:$0xff] }
   0x2   :  { %v14_v1 = vld [vmem:[%s836_s0] sm:$0xff]  ;;  %595 = vmatprep.subr.bf16.mxu0 %v665_v0  ;;  %577 = vmatprep.subr.bf16.mxu1 %v665_v0  ;;  %v17_v5 = vld [vmem:[%s836_s0 + $0x18] sm:$0xff]  ;;  %v19_v7 = vld [vmem:[%s836_s0 + $0x28] sm:$0xff] }
   0x3   :  { %v30_v4 = vpack.c.bf16 %v15_v2, %v14_v1  ;;  %v18_v6 = vld [vmem:[%s836_s0 + $0x20] sm:$0xff]  ;;  %596 = vmatpush3.bf16.msra.mxu0 %v665_v0  ;;  %578 = vmatpush3.bf16.msra.mxu1 %v665_v0  ;;  %v31_v8 = vpack.c.bf16 %v17_v5, %v16_v3  ;;  %v20_v10 = vld [vmem:[%s836_s0 + $0x30] sm:$0xff]  ;;  %v21_v11 = vld [vmem:[%s836_s0 + $0x38] sm:$0xff] }
   0x4   :  { %v32_v9 = vpack.c.bf16 %v19_v7, %v18_v6  ;;  %631 = vmatprep.subr.bf16.mxu1 %v665_v0  ;;  %v33_v14 = vpack.c.bf16 %v21_v11, %v20_v10  ;;  %613 = vmatprep.subr.bf16.mxu0 %v665_v0  ;;  %v22_v19 = vld [vmem:[%s836_s0 + $0x40] sm:$0xff]  ;;  %v23_v24 = vld [vmem:[%s836_s0 + $0x48] sm:$0xff]  ;;  %v24_v25 = vld [vmem:[%s836_s0 + $0x50] sm:$0xff] }
   0x5   :  { %597 = vmatprep.mubr.msk.bf16.mxu0 %vm84_vm0, %v30_v4  ;;  %v38_v12 = vunpack.c.l.bf16 %v30_v4  ;;  %v39_v13 = vunpack.c.h.bf16 %v30_v4  ;;  %v40_v15 = vunpack.c.l.bf16 %v31_v8  ;;  %v41_v16 = vunpack.c.h.bf16 %v31_v8  ;;  %v25_v26 = vld [vmem:[%s836_s0 + $0x58] sm:$0xff]  ;;  %v26_v36 = vld [vmem:[%s836_s0 + $0x60] sm:$0xff]  ;;  %v27_v37 = vld [vmem:[%s836_s0 + $0x68] sm:$0xff] }
   0x6   :  { %v42_v17 = vunpack.c.l.bf16 %v32_v9  ;;  %v43_v18 = vunpack.c.h.bf16 %v32_v9  ;;  %598 = vmatmul.mubr.msk.bf16.vlgmr.msra.gmra.mrb[0].mxu0 %vm84_vm0, %v31_v8  ;;  %v44_v22 = vunpack.c.l.bf16 %v33_v14  ;;  %v45_v23 = vunpack.c.h.bf16 %v33_v14  ;;  %v28_v59 = vld [vmem:[%s836_s0 + $0x70] sm:$0xff]  ;;  %v29_v60 = vld [vmem:[%s836_s0 + $0x78] sm:$0xff] }
   0x7   :  { %v54_v20 = vsub.f32 %v14_v1, %v38_v12  ;;  %v55_v21 = vsub.f32 %v15_v2, %v39_v13  ;;  %v56_v27 = vsub.f32 %v16_v3, %v40_v15  ;;  %v57_v28 = vsub.f32 %v17_v5, %v41_v16  ;;  %614 = vmatpush3.bf16.msra.mxu0 %v665_v0 }
   0x8   :  { %601 = vmatprep.mubr.msk.bf16.mxu0 %vm84_vm0, %v32_v9  ;;  %v58_v29 = vsub.f32 %v18_v6, %v42_v17  ;;  %v59_v31 = vsub.f32 %v19_v7, %v43_v18  ;;  %v60_v33 = vsub.f32 %v20_v10, %v44_v22  ;;  %v723_v34 = vpack.c.bf16 %v23_v24, %v22_v19 }
   0x9   :  { %v70_v30 = vpack.c.bf16 %v55_v21, %v54_v20  ;;  %v71_v32 = vpack.c.bf16 %v57_v28, %v56_v27  ;;  %v725_v35 = vpack.c.bf16 %v25_v26, %v24_v25  ;;  %v61_v41 = vsub.f32 %v21_v11, %v45_v23 }
   0xa   :  { %v72_v40 = vpack.c.bf16 %v59_v31, %v58_v29  ;;  %v46_v44 = vunpack.c.l.bf16 %v723_v34  ;;  %v47_v45 = vunpack.c.h.bf16 %v723_v34  ;;  %v738_v48 = vpack.c.bf16 %v27_v37, %v26_v36 }
   0xb   :  { %579 = vmatprep.mubr.msk.bf16.mxu1 %vm84_vm0, %v70_v30  ;;  %v327_v38 = vunpack.c.l.bf16 %v70_v30  ;;  %v328_v39 = vunpack.c.h.bf16 %v70_v30  ;;  %v329_v42 = vunpack.c.l.bf16 %v71_v32  ;;  %v330_v43 = vunpack.c.h.bf16 %v71_v32 }
   0xc   :  { %580 = vmatmul.mubr.msk.bf16.vlgmr.msra.gmra.mrb[0].mxu1 %vm84_vm0, %v71_v32  ;;  %v62_v49 = vsub.f32 %v22_v19, %v46_v44  ;;  %v63_v50 = vsub.f32 %v23_v24, %v47_v45  ;;  %v48_v51 = vunpack.c.l.bf16 %v725_v35  ;;  %v331_v55 = vunpack.c.l.bf16 %v72_v40 }
   0xd   :  { %v343_v46 = vsub.f32 %v54_v20, %v327_v38  ;;  %v344_v47 = vsub.f32 %v55_v21, %v328_v39  ;;  %632 = vmatpush3.bf16.msra.mxu1 %v665_v0  ;;  %583 = vmatprep.mubr.msk.bf16.mxu1 %vm84_vm0, %v72_v40  ;;  %v345_v52 = vsub.f32 %v56_v27, %v329_v42  ;;  %v49_v57 = vunpack.c.h.bf16 %v725_v35 }
   0xe   :  { %v346_v53 = vsub.f32 %v57_v28, %v330_v43  ;;  %602 = vmatmul.mubr.msk.bf16.gmra.mrb[4].mxu0 %vm84_vm0, %v33_v14  ;;  %v73_v56 = vpack.c.bf16 %v61_v41, %v60_v33  ;;  %v332_v58 = vunpack.c.h.bf16 %v72_v40  ;;  %v74_v61 = vpack.c.bf16 %v63_v50, %v62_v49 }
   0xf   :  { %v359_v54 = vpack.c.bf16 %v344_v47, %v343_v46  ;;  %v347_v62 = vsub.f32 %v58_v29, %v331_v55  ;;  %v50_v63 = vunpack.c.l.bf16 %v738_v48  ;;  %v64_v0 = vsub.f32 %v24_v25, %v48_v51 }
  0x10   :  { %v348_v1 = vsub.f32 %v59_v31, %v332_v58  ;;  %v51_v2 = vunpack.c.h.bf16 %v738_v48  ;;  %v360_v3 = vpack.c.bf16 %v346_v53, %v345_v52  ;;  %v333_v4 = vunpack.c.l.bf16 %v73_v56 }
  0x11   :  { %615 = vmatprep.mubr.msk.bf16.mxu0 %vm84_vm0, %v359_v54  ;;  %v334_v5 = vunpack.c.h.bf16 %v73_v56  ;;  %v37_v6 = vpack.c.bf16 %v29_v60, %v28_v59  ;;  %v65_v7 = vsub.f32 %v25_v26, %v49_v57  ;;  %v335_v9 = vunpack.c.l.bf16 %v74_v61 }
  0x12   :  { %v361_v8 = vpack.c.bf16 %v348_v1, %v347_v62  ;;  %v336_v10 = vunpack.c.h.bf16 %v74_v61  ;;  %v66_v11 = vsub.f32 %v26_v36, %v50_v63  ;;  %v67_v12 = vsub.f32 %v27_v37, %v51_v2 }
  0x13   :  { %v349_v13 = vsub.f32 %v60_v33, %v333_v4  ;;  %v350_v14 = vsub.f32 %v61_v41, %v334_v5  ;;  %v52_v15 = vunpack.c.l.bf16 %v37_v6  ;;  %v75_v16 = vpack.c.bf16 %v65_v7, %v64_v0 }
  0x14   :  { %584 = vmatmul.mubr.msk.bf16.gmra.mrb[4].mxu1 %vm84_vm0, %v73_v56  ;;  %v53_v17 = vunpack.c.h.bf16 %v37_v6  ;;  %v351_v18 = vsub.f32 %v62_v49, %v335_v9  ;;  %v352_v19 = vsub.f32 %v63_v50, %v336_v10  ;;  %v76_v20 = vpack.c.bf16 %v67_v12, %v66_v11 }
  0x15   :  { %587 = vmatprep.mubr.msk.bf16.mxu1 %vm84_vm0, %v74_v61  ;;  %v362_v21 = vpack.c.bf16 %v350_v14, %v349_v13  ;;  %v68_v22 = vsub.f32 %v28_v59, %v52_v15  ;;  %v337_v23 = vunpack.c.l.bf16 %v75_v16  ;;  %v338_v24 = vunpack.c.h.bf16 %v75_v16 }
  0x16   :  { %616 = vmatmul.mubr.msk.bf16.vlgmr.msra.gmra.mrb[0].mxu0 %vm84_vm0, %v360_v3  ;;  %v69_v25 = vsub.f32 %v29_v60, %v53_v17  ;;  %v363_v26 = vpack.c.bf16 %v352_v19, %v351_v18  ;;  %v339_v27 = vunpack.c.l.bf16 %v76_v20  ;;  %v340_v28 = vunpack.c.h.bf16 %v76_v20 }
  0x17   :  { %619 = vmatprep.mubr.msk.bf16.mxu0 %vm84_vm0, %v361_v8  ;;  %v353_v29 = vsub.f32 %v64_v0, %v337_v23  ;;  %v354_v30 = vsub.f32 %v65_v7, %v338_v24 }
  0x18   :  { %v77_v31 = vpack.c.bf16 %v69_v25, %v68_v22  ;;  %v355_v32 = vsub.f32 %v66_v11, %v339_v27  ;;  %v356_v33 = vsub.f32 %v67_v12, %v340_v28 }
  0x19   :  { %v364_v36 = vpack.c.bf16 %v354_v30, %v353_v29 }
  0x1a   :  { %v341_v37 = vunpack.c.l.bf16 %v77_v31  ;;  %v342_v38 = vunpack.c.h.bf16 %v77_v31  ;;  %v365_v39 = vpack.c.bf16 %v356_v33, %v355_v32 }
  0x1c   :  { %588 = vmatmul.mubr.msk.bf16.gmra.mrb[8].mxu1 %vm84_vm0, %v75_v16  ;;  %v357_v40 = vsub.f32 %v68_v22, %v341_v37  ;;  %v358_v41 = vsub.f32 %v69_v25, %v342_v38 }
  0x1d   :  { %591 = vmatprep.mubr.msk.bf16.mxu1 %vm84_vm0, %v76_v20 }
  0x1e   :  { %620 = vmatmul.mubr.msk.bf16.gmra.mrb[4].mxu0 %vm84_vm0, %v362_v21  ;;  %v366_v42 = vpack.c.bf16 %v358_v41, %v357_v40 }
  0x1f   :  { %623 = vmatprep.mubr.msk.bf16.mxu0 %vm84_vm0, %v363_v26 }
  0x24   :  { %592 = vmatmul.mubr.msk.bf16.gmra.mrb[12].mxu1 %vm84_vm0, %v77_v31 }
  0x25   :  { %605 = vmatprep.mubr.msk.bf16.mxu1 %vm84_vm0, %v723_v34 }
  0x26   :  { %624 = vmatmul.mubr.msk.bf16.gmra.mrb[8].mxu0 %vm84_vm0, %v364_v36 }
  0x27   :  { %627 = vmatprep.mubr.msk.bf16.mxu0 %vm84_vm0, %v365_v39 }
  0x2c   :  { %606 = vmatmul.mubr.msk.bf16.vlgmr.msra.gmra.mrb[8].mxu1 %vm84_vm0, %v725_v35 }
  0x2d   :  { %609 = vmatprep.mubr.msk.bf16.mxu1 %vm84_vm0, %v738_v48 }
  0x2e   :  { %628 = vmatmul.mubr.msk.bf16.gmra.mrb[12].mxu0 %vm84_vm0, %v366_v42 }
  0x34   :  { %610 = vmatmul.mubr.msk.bf16.gmra.mrb[12].mxu1 %vm84_vm0, %v37_v6 }
  0xdf   :  { %v581_v43 = vpop.f32.mrb[0].mxu1 }
  0xe0   :  { %v143_v44 = vpop.f32.mrb[1].mxu1 }
  0xe1   :  { %v582_v34 = vpop.f32.mrb[2].mxu1 }
  0xe2   :  { %v146_v45 = vpop.f32.mrb[3].mxu1 }
  0xe7   :  { %v585_v46 = vpop.f32.mrb[4].mxu1 }
  0xe8   :  { %v159_v47 = vpop.f32.mrb[5].mxu1 }
  0xe9   :  { %v586_v49 = vpop.f32.mrb[6].mxu1  ;;  %v617_v51 = vpop.f32.mrb[0].mxu0 }
  0xea   :  { %v162_v50 = vpop.f32.mrb[7].mxu1  ;;  %v633_v52 = vadd.f32 %v617_v51, %v581_v43  ;;  %v425_v53 = vpop.f32.mrb[1].mxu0 }
  0xeb   :  { %v634_v35 = vadd.f32 %v425_v53, %v143_v44  ;;  %v618_v54 = vpop.f32.mrb[2].mxu0 }
  0xec   :  { %507 = vst.msk [vmem:[%s837_s2 + $0x10] sm:$0xff] %vm504_vm1, %v633_v52  ;;  %v635_v48 = vadd.f32 %v618_v54, %v582_v34  ;;  %v428_v55 = vpop.f32.mrb[3].mxu0 }
  0xed   :  { %505 = vst.msk [vmem:[%s837_s2] sm:$0xff] %vm504_vm1, %v634_v35  ;;  %v636_v56 = vadd.f32 %v428_v55, %v146_v45 }
  0xee   :  { %508 = vst.msk [vmem:[%s837_s2 + $0x18] sm:$0xff] %vm504_vm1, %v635_v48 }
  0xef   :  { %506 = vst.msk [vmem:[%s837_s2 + $0x8] sm:$0xff] %vm504_vm1, %v636_v56 }
  0xf1   :  { %v621_v57 = vpop.f32.mrb[4].mxu0 }
  0xf2   :  { %v637_v58 = vadd.f32 %v621_v57, %v585_v46  ;;  %v441_v59 = vpop.f32.mrb[5].mxu0 }
  0xf3   :  { %v638_v60 = vadd.f32 %v441_v59, %v159_v47  ;;  %v622_v61 = vpop.f32.mrb[6].mxu0 }
  0xf4   :  { %511 = vst.msk [vmem:[%s837_s2 + $0x30] sm:$0xff] %vm504_vm1, %v637_v58  ;;  %v639_v62 = vadd.f32 %v622_v61, %v586_v49  ;;  %v444_v63 = vpop.f32.mrb[7].mxu0 }
  0xf5   :  { %509 = vst.msk [vmem:[%s837_s2 + $0x20] sm:$0xff] %vm504_vm1, %v638_v60  ;;  %v640_v0 = vadd.f32 %v444_v63, %v162_v50 }
  0xf6   :  { %512 = vst.msk [vmem:[%s837_s2 + $0x38] sm:$0xff] %vm504_vm1, %v639_v62 }
  0xf7   :  { %510 = vst.msk [vmem:[%s837_s2 + $0x28] sm:$0xff] %vm504_vm1, %v640_v0 }
  0xf9   :  { %v625_v1 = vpop.f32.mrb[8].mxu0 }
  0xfa   :  { %v457_v2 = vpop.f32.mrb[9].mxu0 }
  0xfb   :  { %v626_v3 = vpop.f32.mrb[10].mxu0 }
  0xfc   :  { %v460_v4 = vpop.f32.mrb[11].mxu0 }
  0xff   :  { %v607_v5 = vpop.f32.mrb[8].mxu1 }
 0x100   :  { %v641_v6 = vadd.f32 %v625_v1, %v607_v5  ;;  %v296_v7 = vpop.f32.mrb[9].mxu1 }
 0x101   :  { %v642_v8 = vadd.f32 %v457_v2, %v296_v7  ;;  %v608_v9 = vpop.f32.mrb[10].mxu1  ;;  %v629_v12 = vpop.f32.mrb[12].mxu0 }
 0x102   :  { %515 = vst.msk [vmem:[%s837_s2 + $0x50] sm:$0xff] %vm504_vm1, %v641_v6  ;;  %v643_v10 = vadd.f32 %v626_v3, %v608_v9  ;;  %v299_v11 = vpop.f32.mrb[11].mxu1  ;;  %v473_v14 = vpop.f32.mrb[13].mxu0 }
 0x103   :  { %513 = vst.msk [vmem:[%s837_s2 + $0x40] sm:$0xff] %vm504_vm1, %v642_v8  ;;  %v644_v13 = vadd.f32 %v460_v4, %v299_v11  ;;  %v630_v15 = vpop.f32.mrb[14].mxu0 }
 0x104   :  { %516 = vst.msk [vmem:[%s837_s2 + $0x58] sm:$0xff] %vm504_vm1, %v643_v10  ;;  %v476_v16 = vpop.f32.mrb[15].mxu0 }
 0x105   :  { %514 = vst.msk [vmem:[%s837_s2 + $0x48] sm:$0xff] %vm504_vm1, %v644_v13 }
 0x107   :  { %v611_v17 = vpop.f32.mrb[12].mxu1 }
 0x108   :  { %v645_v18 = vadd.f32 %v629_v12, %v611_v17  ;;  %v312_v19 = vpop.f32.mrb[13].mxu1 }
 0x109   :  { %v646_v20 = vadd.f32 %v473_v14, %v312_v19  ;;  %v612_v21 = vpop.f32.mrb[14].mxu1 }
 0x10a   :  { %519 = vst.msk [vmem:[%s837_s2 + $0x70] sm:$0xff] %vm504_vm1, %v645_v18  ;;  %v647_v22 = vadd.f32 %v630_v15, %v612_v21  ;;  %v315_v23 = vpop.f32.mrb[15].mxu1 }
 0x10b   :  { %517 = vst.msk [vmem:[%s837_s2 + $0x60] sm:$0xff] %vm504_vm1, %v646_v20  ;;  %v648_v24 = vadd.f32 %v476_v16, %v315_v23 }
 0x10c   :  { %520 = vst.msk [vmem:[%s837_s2 + $0x78] sm:$0xff] %vm504_vm1, %v647_v22 }
 0x10d   :  { %518 = vst.msk [vmem:[%s837_s2 + $0x68] sm:$0xff] %vm504_vm1, %v648_v24 }

</bundles_post_ra>
